<compile_context>
chip_gen: v7x
topology: tpu7x:2x2x1
jax: 0.10.0
libtpu: 0.0.40
codegen_flags: <defaults>
</compile_context>

<pallas_src>
import jax
import jax.numpy as jnp
from jax import lax
from jax.experimental import pallas as pl
from jax.experimental.pallas import tpu as pltpu


# ----------------------- geometry helpers (match the PyTorch ones) -------------------
def sixD2mtx(r6d):
    # r6d: (3, 2) -> rotation matrix (3, 3), Zhou et al. 6D representation
    a1 = r6d[:, 0]
    a2 = r6d[:, 1]
    b1 = a1 / jnp.sqrt(jnp.sum(a1 * a1))
    b2 = a2 - jnp.sum(b1 * a2) * b1
    b2 = b2 / jnp.sqrt(jnp.sum(b2 * b2))
    b3 = jnp.cross(b1, b2)
    return jnp.stack([b1, b2, b3], axis=-1)  # columns are b1, b2, b3


def mtx2sixD(R):
    return R[:, :2]


def pts2px(xyz_local, f, centre):
    # f: (1,), centre: (2,), xyz_local: (3,)
    return f * xyz_local[:2] / xyz_local[2] + centre


def project(xyz, R6D_t, f, centre):
    R6D = R6D_t[:6].reshape(3, 2)
    t = R6D_t[6:9]
    R = sixD2mtx(R6D)
    xyz_local = R @ xyz + t
    return pts2px(xyz_local, f, centre)


def get_residual(xyz, R6D_t, f, centre, uv):
    return project(xyz, R6D_t, f, centre) - uv


# ----------------------- forward-mode Jacobian, parameter-major layout ----------------
def _aug_jac_res(xyz, R6D_t, f, centre, uv):
    """Per (point, camera): augmented block [J^T ; r^T] of shape (10, 2), plus r (2,).

    The Jacobian is built by pushing the 9 standard-basis tangents through jvp
    (numerically identical to torch.func.jacfwd / jax.jacfwd), but laid out
    parameter-major so the caller gets a lane-dense (params, observations) tensor
    from a pure reshape -- no big transpose on the host side.
    """
    fn = lambda p: get_residual(xyz, p, f, centre, uv)

    def push(v):
        return jax.jvp(fn, (R6D_t,), (v,))[1]

    jac_t = jax.vmap(push)(jnp.eye(9, dtype=R6D_t.dtype))   # (9, 2)
    res = fn(R6D_t)                                          # (2,)
    aug = jnp.concatenate([jac_t, res[None, :]], axis=0)     # (10, 2)
    return aug, res


# ----------------------- Pallas kernel: fused per-camera weighted Gram ---------------
def _block_gram_kernel(a_ref, w_ref, g_ref, acc_ref):
    """Accumulate G_c = (W A_c)(W A_c)^T per camera over lane-dense row tiles.

    a_ref:   (C, P_aug, tr)   [J^T ; r^T] block, observations on the lane axis
    w_ref:   (C, 1, tr)       IRLS weights (mask * huber); 0 on invalid / padded rows
    g_ref:   (C, P_aug, P_aug)  output block (written once, at the last tile)
    acc_ref: (C, P_aug, P_aug)  f32 VMEM scratch accumulator
    """
    t = pl.program_id(1)

    @pl.when(t == 0)
    def _init():
        acc_ref[...] = jnp.zeros_like(acc_ref)

    a = a_ref[...]
    w = w_ref[...]
    # Zero invalid rows outright: 0 * NaN/Inf residuals of masked / padded observations
    # must not poison the Gram matrix.
    aw = jnp.where(w > 0.0, a * w, 0.0)
    # Single fused batched MXU contraction over the observation (lane) axis:
    #   G[:,:9,:9] = J^T W^2 J,   G[:,:9,9] = J^T W^2 r
    acc_ref[...] += lax.dot_general(aw, aw, (((2,), (2,)), ((0,), (0,))),
                                    preferred_element_type=jnp.float32)

    @pl.when(t == pl.num_programs(1) - 1)
    def _done():
        g_ref[...] = acc_ref[...]


def blockdiag_normal_equations(A, w, tile_rows=32768):
    """A: (C, P_aug, N) per-camera [J^T ; r^T]; w: (C, 1, N) weights.

    Returns (jtj_blocks: (C, P, P), jtr_blocks: (C, P)) with
      jtj = J^T W^2 J   and   jtr = J^T W^2 r.
    """
    C, P_aug, N = A.shape
    P = P_aug - 1

    # 128-aligned (lane) row tiles + zero padding: no divisibility requirement on N.
    tr = int(min(tile_rows, N))
    if tr < N:
        tr = max(128, (tr // 128) * 128)
    n_tiles_total = pl.cdiv(N, tr)
    pad = n_tiles_total * tr - N
    if pad:
        A = jnp.pad(A, ((0, 0), (0, 0), (0, pad)))
        w = jnp.pad(w, ((0, 0), (0, 0), (0, pad)))   # padded rows have w == 0

    # Optional 2-way split of the row reduction so both v7x TensorCores stay busy
    # when npts is large; the two partial Grams are summed in the wrapper.
    if n_tiles_total >= 2 and n_tiles_total % 2 == 0:
        n_split, n_tiles = 2, n_tiles_total // 2
    else:
        n_split, n_tiles = 1, n_tiles_total

    G_parts = pl.pallas_call(
        _block_gram_kernel,
        out_shape=jax.ShapeDtypeStruct((n_split, C, P_aug, P_aug), jnp.float32),
        grid_spec=pltpu.PrefetchScalarGridSpec(
            num_scalar_prefetch=0,
            grid=(n_split, n_tiles),              # parallel split x row reduction (last)
            in_specs=[
                pl.BlockSpec((C, P_aug, tr), lambda s, t: (0, 0, s * n_tiles + t)),
                pl.BlockSpec((C, 1, tr), lambda s, t: (0, 0, s * n_tiles + t)),
            ],
            out_specs=pl.BlockSpec((None, C, P_aug, P_aug),
                                   lambda s, t: (s, 0, 0, 0)),
            scratch_shapes=[pltpu.VMEM((C, P_aug, P_aug), jnp.float32)]),
        compiler_params=pltpu.CompilerParams(
            dimension_semantics=("parallel", "arbitrary")),
    )(A.astype(jnp.float32), w.astype(jnp.float32))

    G = G_parts.sum(axis=0)
    return G[:, :P, :P], G[:, :P, P]


# ----------------------- MiniBAInternal (JAX port) -----------------------------------
class MiniBAPallas:
    def __init__(self, batch, n_opt_cams, n_fixed_cams, npts, optimize_focal,
                 optimize_3Dpts, huber_delta, outlier_mad_scale, lm, ep, k, iters):
        self.batch = batch
        self.n_opt_cams = n_opt_cams
        self.n_fixed_cams = n_fixed_cams
        self.n_cams = n_opt_cams + n_fixed_cams
        self.npts = npts
        self.optimize_focal = optimize_focal
        self.optimize_3Dpts = optimize_3Dpts
        self.huber_delta = huber_delta
        self.outlier_mad_scale = outlier_mad_scale
        self.lm = lm
        self.ep = ep
        self.k = k
        self.iters = iters
        self.n_cam_params = n_opt_cams * 9 + int(optimize_focal)
        # Only the poses-only configuration is implemented here.
        # TODO(synk): optimize_focal / optimize_3Dpts (Schur complement) branches not implemented.
        assert not optimize_focal and not optimize_3Dpts

        # Jacobian + residual, produced camera-major & parameter-major:
        #   aug: (n_cams, 10, npts, 2)   res: (n_cams, npts, 2)
        point_fn = jax.vmap(_aug_jac_res,
                            in_axes=(0, None, None, None, 0), out_axes=(1, 0))
        self._augjac_fn = jax.vmap(point_fn,
                                   in_axes=(None, 0, None, None, 1), out_axes=(0, 0))

        # Residual only, point-major (npts, n_cams, 2) like the reference.
        self._res_pm = jax.vmap(
            jax.vmap(get_residual, in_axes=(None, 0, None, None, 0)),
            in_axes=(0, None, None, None, 0))

    # ---- helpers -------------------------------------------------------------------
    def get_mask(self, r_in, original_mask2):
        # TODO(synk): outlier_mad_scale > 0 branch (torch.quantile MAD rejection) not implemented.
        # (The torch else-branch `original_mask2.expand(-1,-1,2)` relies on an implicit
        #  unsqueeze; we implement the intended per-observation broadcast to the 2 pixel coords.)
        mask = jnp.broadcast_to(original_mask2[..., None],
                                (self.npts, self.n_cams, 2))
        return mask.reshape(-1).astype(jnp.float32)

    def get_huber_weights(self, r):
        if self.huber_delta > 0:
            r_abs = jnp.abs(r)
            return jnp.where(r_abs <= self.huber_delta,
                             1.0, self.huber_delta / jnp.sqrt(r_abs))
        return jnp.ones_like(r)

    # ---- core LM loop ---------------------------------------------------------------
    def optimize(self, Rs6D, ts, f, xyz, centre, uv):
        uv = uv.reshape(self.npts, self.n_cams, 2)
        original_mask2 = jnp.all(uv >= 0, axis=-1)            # (npts, n_cams)
        lm = jnp.asarray(self.lm, jnp.float32)
        initial_r = None
        Rs6D_tmp, ts_tmp, f_tmp, xyz_tmp = Rs6D, ts, f, xyz
        eye9 = jnp.eye(9, dtype=bool)
        C = self.n_opt_cams
        N = self.npts * 2

        for iteration in range(self.iters):
            Rs6D_ts = jnp.concatenate([Rs6D.reshape(-1, 6), ts], axis=-1)   # (n_cams, 9)
            aug_cm, r_cm = self._augjac_fn(xyz, Rs6D_ts, f, centre, uv)
            # aug_cm: (n_cams, 10, npts, 2)  parameter-major [J^T ; r^T] per camera
            # r_cm:   (n_cams, npts, 2)

            r_in_pnc = jnp.transpose(r_cm, (1, 0, 2))         # tiny (npts, n_cams, 2)
            r_in = r_in_pnc.reshape(-1)
            if iteration == 0:
                initial_r = r_in

            # weights (needed host-side for the LM acceptance test anyway)
            huber_w = self.get_huber_weights(r_in)
            mask = self.get_mask(r_in, original_mask2)
            weights = mask * huber_w                          # (npts*n_cams*2,)
            r = r_in * weights

            # ---- Pallas hot path: per-camera fused weighted normal equations --------
            # Only the tiny weight tensor is transposed; the big Jacobian is already
            # camera-major / lane-dense, so A is a pure reshape.
            w_cm = jnp.transpose(weights.reshape(self.npts, self.n_cams, 2),
                                 (1, 0, 2))
            w_blocks = w_cm[:C].reshape(C, 1, N)
            A = aug_cm[:C].reshape(C, 10, N)                  # (C, P_aug, N)
            jtj_blocks, jacxr_blocks = blockdiag_normal_equations(A, w_blocks)

            # LM damping: identical to the reference diagonal ops, per 9x9 block.
            diag = jnp.diagonal(jtj_blocks, axis1=-2, axis2=-1)   # (C, 9)
            diag = jnp.maximum(diag * (1.0 + lm), self.ep)
            jtj_damped = jnp.where(eye9, diag[:, None, :], jtj_blocks)

            # Block-diagonal inverse == inv(full block-diag JtJ); matches torch inv_ex path.
            dcam_blocks = jnp.matmul(jnp.linalg.inv(jtj_damped),
                                     jacxr_blocks[..., None])[..., 0]
            dcam_blocks = jnp.nan_to_num(dcam_blocks)             # (C, 9)
            dR = dcam_blocks[:, :6].reshape(-1, 3, 2)
            dt = dcam_blocks[:, 6:]
            df = 0.0
            dxyz = 0.0

            # TODO(synk): with n_fixed_cams > 0 this pose update shape-mismatches,
            # exactly like the PyTorch reference; only n_fixed_cams == 0 is exercised.
            Rs6D_tmp = Rs6D - dR
            ts_tmp = ts - dt
            f_tmp = f - df
            xyz_tmp = xyz - dxyz

            Rs6D_ts_tmp = jnp.concatenate([Rs6D_tmp.reshape(-1, 6), ts_tmp], axis=-1)
            new_r = self._res_pm(xyz_tmp, Rs6D_ts_tmp, f_tmp, centre, uv).reshape(-1)
            w2 = self.get_huber_weights(new_r) * mask
            new_r = new_r * w2

            success_mask = (jnp.mean(new_r ** 2) < jnp.mean(r ** 2)) * (f_tmp > 0)
            success_mask = success_mask.astype(jnp.float32)       # shape (1,)

            Rs6D = Rs6D - success_mask * dR
            ts = ts - success_mask * dt
            f = f - success_mask * df
            xyz = xyz - success_mask * dxyz
            lm = lm * (1.0 / self.k * success_mask + self.k * (1.0 - success_mask))
            Rs6D = jax.vmap(lambda R: mtx2sixD(sixD2mtx(R)))(Rs6D)

        Rs6D_ts_tmp = jnp.concatenate([Rs6D_tmp.reshape(-1, 6), ts_tmp], axis=-1)
        r = self._res_pm(xyz_tmp, Rs6D_ts_tmp, f_tmp, centre, uv).reshape(-1)
        mask = self.get_mask(r, original_mask2)
        return Rs6D, ts, f, xyz, r, initial_r, mask

    def forward(self, Rs6D, ts, f, xyz, centre, uv):
        if self.batch > 1:
            # TODO(synk): batched (vmap over batch) path not exercised in this script.
            f_b = jnp.broadcast_to(f[None], (self.batch,) + f.shape)
            c_b = jnp.broadcast_to(centre[None], (self.batch,) + centre.shape)
            return jax.vmap(self.optimize)(Rs6D, ts, f_b, xyz, c_b, uv)
        if Rs6D.ndim == 4:
            Rs6D, ts, xyz, uv = Rs6D[0], ts[0], xyz[0], uv[0]
        return self.optimize(Rs6D, ts, f, xyz, centre, uv)


# ----------------------- main --------------------------------------------------------
if __name__ == "__main__":
    npts, n_opt_cams, n_fixed_cams = 128, 2, 0
    n_cams = n_opt_cams + n_fixed_cams

    model = MiniBAPallas(batch=1, n_opt_cams=n_opt_cams, n_fixed_cams=n_fixed_cams,
                         npts=npts, optimize_focal=False, optimize_3Dpts=False,
                         huber_delta=1.0, outlier_mad_scale=0.0,
                         lm=1e-3, ep=1e-6, k=2.0, iters=2)

    key = jax.random.PRNGKey(0)
    k1, k2, k3, k4, k5, k6 = jax.random.split(key, 6)

    # deterministic synthetic scene: points in front of near-identity cameras
    xyz = jnp.concatenate(
        [jax.random.uniform(k1, (npts, 2), minval=-1.0, maxval=1.0),
         jax.random.uniform(k2, (npts, 1), minval=3.0, maxval=6.0)], axis=-1)
    Rs6D_true = jnp.broadcast_to(jnp.eye(3, dtype=jnp.float32)[:, :2], (n_cams, 3, 2))
    ts_true = 0.05 * jax.random.normal(k3, (n_cams, 3))
    f = jnp.array([128.0], dtype=jnp.float32)
    centre = jnp.array([64.0, 64.0], dtype=jnp.float32)

    # observations = projection with true params + pixel noise
    proj = jax.vmap(jax.vmap(project, in_axes=(None, 0, None, None)),
                    in_axes=(0, None, None, None))
    Rs6D_ts_true = jnp.concatenate([Rs6D_true.reshape(-1, 6), ts_true], axis=-1)
    uv = proj(xyz, Rs6D_ts_true, f, centre)          # (npts, n_cams, 2)
    uv = uv + 0.5 * jax.random.normal(k4, uv.shape)

    # perturbed initial camera guess
    Rs6D0 = Rs6D_true + 0.02 * jax.random.normal(k5, Rs6D_true.shape)
    ts0 = ts_true + 0.05 * jax.random.normal(k6, ts_true.shape)

    outs = jax.jit(model.forward)(Rs6D0, ts0, f, xyz, centre, uv)
    jax.block_until_ready(outs)
    print("KERNEL_OK")
</pallas_src>

<mosaic_0001>
module attributes {stable_mosaic.version = 11 : i64} {
  func.func @_block_gram_kernel(%arg0: i32, %arg1: i32, %arg2: memref<2x10x256xf32, #tpu.memory_space<vmem>>, %arg3: memref<2x1x256xf32, #tpu.memory_space<vmem>>, %arg4: memref<1x2x10x10xf32, #tpu.memory_space<vmem>>, %arg5: memref<2x10x10xf32, #tpu.memory_space<vmem>>) attributes {dimension_semantics = [#tpu.dimension_semantics<parallel>, #tpu.dimension_semantics<arbitrary>], iteration_bounds = array<i64: 1, 1>, scalar_prefetch = 0 : i64, scratch_operands = 1 : i64, tpu.core_type = #tpu.core_type<tc>, window_params = [{transform_indices = @transform_0, window_bounds = array<i64: 2, 10, 256>}, {transform_indices = @transform_1, window_bounds = array<i64: 2, 1, 256>}, {transform_indices = @transform_2, window_bounds = array<i64: 1, 2, 10, 10>}]} {
    %c0_i32 = arith.constant 0 : i32
    %0 = arith.cmpi eq, %arg1, %c0_i32 : i32
    %1 = arith.extui %0 : i1 to i32
    %c0_i32_0 = arith.constant 0 : i32
    %2 = arith.cmpi ne, %1, %c0_i32_0 : i32
    scf.if %2 {
      %cst_16 = arith.constant 0.000000e+00 : f32
      %20 = vector.broadcast %cst_16 : f32 to vector<2x10x10xf32>
      %c0_17 = arith.constant 0 : index
      %c0_18 = arith.constant 0 : index
      %c0_19 = arith.constant 0 : index
      %21 = vector.load %arg5[%c0_17, %c0_18, %c0_19] : memref<2x10x10xf32, #tpu.memory_space<vmem>>, vector<2x10x10xf32>
      tpu.vector_store %arg5[%c0_17, %c0_18, %c0_19], %20 {strides = array<i32>} : memref<2x10x10xf32, #tpu.memory_space<vmem>>, vector<2x10x10xf32>,
    } else {
    }
    %c0 = arith.constant 0 : index
    %c0_1 = arith.constant 0 : index
    %c0_2 = arith.constant 0 : index
    %3 = vector.load %arg2[%c0, %c0_1, %c0_2] : memref<2x10x256xf32, #tpu.memory_space<vmem>>, vector<2x10x256xf32>
    %c0_3 = arith.constant 0 : index
    %c0_4 = arith.constant 0 : index
    %c0_5 = arith.constant 0 : index
    %4 = vector.load %arg3[%c0_3, %c0_4, %c0_5] : memref<2x1x256xf32, #tpu.memory_space<vmem>>, vector<2x1x256xf32>
    %cst = arith.constant 0.000000e+00 : f32
    %5 = vector.broadcast %cst : f32 to vector<2x1x256xf32>
    %6 = arith.cmpf ogt, %4, %5 : vector<2x1x256xf32>
    %7 = vector.broadcast %4 : vector<2x1x256xf32> to vector<2x10x256xf32>
    %8 = arith.mulf %3, %7 : vector<2x10x256xf32>
    %cst_6 = arith.constant 0.000000e+00 : f32
    %9 = vector.shape_cast %6 : vector<2x1x256xi1> to vector<2x1x256xi1>
    %10 = vector.broadcast %9 : vector<2x1x256xi1> to vector<2x10x256xi1>
    %11 = vector.broadcast %cst_6 : f32 to vector<2x10x256xf32>
    %12 = arith.select %10, %8, %11 : vector<2x10x256xi1>, vector<2x10x256xf32>
    %c0_7 = arith.constant 0 : index
    %c0_8 = arith.constant 0 : index
    %c0_9 = arith.constant 0 : index
    %13 = vector.load %arg5[%c0_7, %c0_8, %c0_9] : memref<2x10x10xf32, #tpu.memory_space<vmem>>, vector<2x10x10xf32>
    %cst_10 = arith.constant dense<0.000000e+00> : vector<2x10x10xf32>
    %14 = tpu.matmul %12, %12, %cst_10 {dimension_numbers = #tpu.dot_dimension_numbers<[2], [2], [1], [1], [0, 0, 0, 1, 1, 1], [0], [0]>} : vector<2x10x256xf32>, vector<2x10x256xf32>, vector<2x10x10xf32> -> vector<2x10x10xf32>
    %15 = arith.addf %13, %14 : vector<2x10x10xf32>
    %c0_11 = arith.constant 0 : index
    %c0_12 = arith.constant 0 : index
    %c0_13 = arith.constant 0 : index
    %16 = vector.load %arg5[%c0_11, %c0_12, %c0_13] : memref<2x10x10xf32, #tpu.memory_space<vmem>>, vector<2x10x10xf32>
    tpu.vector_store %arg5[%c0_11, %c0_12, %c0_13], %15 {strides = array<i32>} : memref<2x10x10xf32, #tpu.memory_space<vmem>>, vector<2x10x10xf32>,
    %c0_i32_14 = arith.constant 0 : i32
    %17 = arith.cmpi eq, %arg1, %c0_i32_14 : i32
    %18 = arith.extui %17 : i1 to i32
    %c0_i32_15 = arith.constant 0 : i32
    %19 = arith.cmpi ne, %18, %c0_i32_15 : i32
    scf.if %19 {
      %c0_16 = arith.constant 0 : index
      %c0_17 = arith.constant 0 : index
      %c0_18 = arith.constant 0 : index
      %20 = vector.load %arg5[%c0_16, %c0_17, %c0_18] : memref<2x10x10xf32, #tpu.memory_space<vmem>>, vector<2x10x10xf32>
      %c0_19 = arith.constant 0 : index
      %c0_20 = arith.constant 0 : index
      %c0_21 = arith.constant 0 : index
      %c0_22 = arith.constant 0 : index
      %21 = vector.load %arg4[%c0_19, %c0_20, %c0_21, %c0_22] : memref<1x2x10x10xf32, #tpu.memory_space<vmem>>, vector<1x2x10x10xf32>
      %22 = vector.shape_cast %21 : vector<1x2x10x10xf32> to vector<2x10x10xf32>
      %23 = vector.shape_cast %20 : vector<2x10x10xf32> to vector<1x2x10x10xf32>
      tpu.vector_store %arg4[%c0_19, %c0_20, %c0_21, %c0_22], %23 {strides = array<i32>} : memref<1x2x10x10xf32, #tpu.memory_space<vmem>>, vector<1x2x10x10xf32>,
    } else {
    }
    return
  }
  func.func @transform_0(%arg0: i32, %arg1: i32) -> (i32, i32, i32) {
    %c1_i32 = arith.constant 1 : i32
    %0 = arith.muli %arg0, %c1_i32 : i32
    %1 = arith.addi %0, %arg1 : i32
    %c0_i32 = arith.constant 0 : i32
    %c0_i32_0 = arith.constant 0 : i32
    %c0_i32_1 = arith.constant 0 : i32
    return %c0_i32, %c0_i32_0, %1 : i32, i32, i32
  }
  func.func @transform_1(%arg0: i32, %arg1: i32) -> (i32, i32, i32) {
    %c1_i32 = arith.constant 1 : i32
    %0 = arith.muli %arg0, %c1_i32 : i32
    %1 = arith.addi %0, %arg1 : i32
    %c0_i32 = arith.constant 0 : i32
    %c0_i32_0 = arith.constant 0 : i32
    %c0_i32_1 = arith.constant 0 : i32
    return %c0_i32, %c0_i32_0, %1 : i32, i32, i32
  }
  func.func @transform_2(%arg0: i32, %arg1: i32) -> (i32, i32, i32, i32) {
    %c0_i32 = arith.constant 0 : i32
    %c0_i32_0 = arith.constant 0 : i32
    %c0_i32_1 = arith.constant 0 : i32
    %c0_i32_2 = arith.constant 0 : i32
    return %arg0, %c0_i32, %c0_i32_0, %c0_i32_1 : i32, i32, i32, i32
  }
}

</mosaic_0001>

<bundles_post_ra>
// kernel: custom-call.26
= control target key start
LH: loop header
LB: loop body
LE: loop exit
PB: predicated region body
PF: predicated region fallthrough
CT: control target
= control target key end

     0   :  { %5 = vsyncpa [#allocation4], 0  ;;  %s964_s0 = inlined_call_operand.vmem [shape: f32[2,9,9], index: 0, kind: input, shape index: {}]   ;;  %s965_s1 = inlined_call_operand.vmem [shape: f32[2,9,9], index: 1, kind: output, shape index: {0}]   ;;  %s966_s2 = inlined_call_operand.hbm [shape: s32[2,9], index: 2, kind: output, shape index: {1}]   ;;  %s967_s3 = inlined_call_operand.vmem [shape: s32[2,9], index: 3, kind: output, shape index: {2}]  }
   0x1   :  { %7 = vsyncpa [#allocation4 + $0x1], 0  ;;  %s755_s12 = smov 0   ;;  %s757_s13 = smov 0  }
   0x2   :  { %s759_s14 = smov 0   ;;  %s761_s15 = smov 0  }
   0x3 LB: > { %s776_s16 = sadd.s32 4294967295, %s723_s15   ;;  %s565_s17 = sadd.s32 4294967294, %s723_s15   ;;  %s723_s15 = sphi %s761_s15, %s975_s15   ;;  %s719_s14 = sphi %s759_s14, %s974_s14   ;;  %s715_s13 = sphi %s757_s13, %s973_s13   ;;  %s711_s12 = sphi %s755_s12, %s972_s12  }
   0x4   : > { %s780_s18 = sadd.s32 1, %s723_s15   ;;  %s17_s19 = sshrl.u32 %s723_s15, 3 }
   0x5   : > { %s18_s20 = sshrl.u32 %s780_s18, 3  ;;  %s22_s21 = sadd.s32 1, %s719_s14 }
   0x6   : > { %s19_s22 = ssub.s32 %s17_s19, %s18_s20  ;;  %p32_p0 = scmp.ne.s32.totalorder %s719_s14, %s715_s13 }
   0x7   : > { %p20_p1 = scmp.eq.s32.totalorder %s19_s22, 0  ;;  %p33_p2 = scmp.eq.s32.totalorder %s776_s16, 1 }
   0x8   : > { %p38_p3 = scmp.ne.s32.totalorder %s715_s13, %s711_s12  ;;  %p39_p4 = scmp.eq.s32.totalorder %s565_s17, 1 }
   0x9   : > { %s791_s23 = scalar_select %p20_p1, %s719_s14, %s22_s21  }
   0xa   : > { %p793_p5 = por %p33_p2, %p32_p0  ;;  %p797_p6 = por %p39_p4, %p38_p3 }
   0xb   : > { %p567_p7 = scmp.ge.s32.totalorder %s723_s15, 2 }
   0xc   : > { %s85_s26 = sand.u32 (!%p567_p7), 1, %s723_s15   ;;  %s569_s27 = sshll.u32 (!%p567_p7), %s723_s15, 4 }
   0xd   : > { %83 = sbr.rel (%p567_p7) target bundleno = 20 (0x14), region = 16  ;;  %s568_s28 = sshll.u32 (!%p567_p7), %s85_s26, 4 }
   0xe   : > { %s89_s4 = scalar_lea.vmem (!%p567_p7), %s964_s0, %s569_s27  ;;  %s87_s5 = scalar_lea.vmem (!%p567_p7), [#allocation0], %s568_s28 }
   0xf   : > { %v102_v0 = vld [vmem:[%s89_s4] sm:$0xff] (!%p567_p7)  ;;  %v104_v1 = vld [vmem:[%s89_s4 + $0x8] sm:$0xff] (!%p567_p7) }
  0x10   : > { %103 = vst [vmem:[%s87_s5] sm:$0xff] (!%p567_p7), %v102_v0  ;;  %105 = vst [vmem:[%s87_s5 + $0x8] sm:$0xff] (!%p567_p7), %v104_v1 }
  0x14 PF: > { %p570_p8 = scmp.ge.s32.totalorder %s723_s15, 1  ;;  %p110_p9 = scmp.lt.s32.totalorder %s723_s15, 3 }
  0x16   : > { %p111_p10 = pnand %p570_p8, %p110_p9 }
  0x18   : > { %114 = sbr.rel (%p111_p10) target bundleno = 450 (0x1c2), region = 39 }
  0x1f   : > { %s117_s6 = sand.u32 1, %s776_s16   ;;  %s132_s7 = sand.u32 1, %s715_s13   ;;  %v154_v2 = vlaneseq  ;;  %v733_v6 = vmov 0  }
  0x20   : > { %s571_s8 = sshll.u32 %s117_s6, 4  ;;  %s815_s9 = sshll.u32 %s132_s7, 1 }
  0x21   : > { %v818_v3 = vshrl.u32 %v154_v2, 7  ;;  %s119_s10 = scalar_lea.vmem [#allocation0], %s571_s8  ;;  %s820_s11 = scalar_lea.vmem [#allocation1], %s571_s8 }
  0x22   : > { %v143_v4 = vld [vmem:[%s119_s10] sm:$0xff]  ;;  %v575_v5 = vld [vmem:[%s119_s10 + $0x8] sm:$0xff]  ;;  %s149_s17 = sand.u32 7, %s776_s16   ;;  %s134_s20 = scalar_lea.vmem [#allocation3], %s815_s9 }
  0x23   : > { %144 = vst [vmem:[%s820_s11] sm:$0xff] %v143_v4  ;;  %576 = vst [vmem:[%s820_s11 + $0x8] sm:$0xff] %v575_v5  ;;  %s825_s19 = scalar_lea.vmem [#allocation2], %s149_s17  ;;  %s140_s21 = scalar_lea.vmem [#allocation6], %s815_s9 }
  0x24   : > { %153 = vst [vmem:[%s825_s19] sm:$0x1] %v733_v6  ;;  %s830_s22 = scalar_lea.vmem [#allocation5], %s149_s17  ;;  %s725_s26 = smov 0  }
  0x25 LB: >> { %s577_s27 = sshll.u32 %s727_s26, 3  ;;  %s162_s26 = sadd.s32 1, %s727_s26   ;;  %s727_s26 = sphi %s725_s26, %s162_s26  }
  0x26   : >> { %v166_v7 = vstv %s577_s27  ;;  %s164_s28 = scalar_lea.vmem [#allocation7], %s577_s27  ;;  %p159_p11 = scmp.ge.s32.totalorder %s162_s26, 2  }
  0x27   : >> { %v167_v8 = vadd.s32 %v166_v7, %v818_v3  ;;  %s833_s29 = smov (%p159_p11), 0  }
  0x28   : > { %161 = sbr.rel (!%p159_p11) target bundleno = 37 (0x25), region = 191 }
  0x29   : >> { %168 = vst [vmem:[%s164_s28] sm:$0xff] %v167_v8 }
  0x2f LB: >> { %v179_v9 = vld [vmem:[%s820_s11] sm:$0xff]  ;;  %v580_v10 = vld [vmem:[%s820_s11 + $0x8] sm:$0xff]  ;;  %v841_v11 = vadd.s32 8, %v818_v3  ;;  %v844_v13 = vstv %s731_s29  ;;  %s237_s30 = ssub.s32 128, %s731_s29  ;;  %v243_v46 = vand.u32 127, %v154_v2  ;;  %s249_s4 = scalar_lea.vmem %s820_s11, %s731_s29 [#allocation1]  ;;  %s731_s29 = sphi %s833_s29, %s174_s29  }
  0x30   : >> { %v180_v12 = vand.u32 2147483647, %v179_v9  ;;  %v192_v14 = vand.u32 2147483647, %v580_v10  ;;  %vm183_vm1 = vcmp.ge.s32.totalorder %v818_v3, %v844_v13  ;;  %v246_v49 = vld [vmem:[%s825_s19] ss:$0 sm:$0xff] }
  0x31   : >> { %vm196_vm0 = vcmp.lt.s32.totalorder %v841_v11, 9  ;;  %vm195_vm3 = vcmp.ge.s32.totalorder %v841_v11, %v844_v13  ;;  %vm267_vm15 = vcmp.gt.s32.totalorder %v243_v46, %v844_v13  ;;  %v251_v50 = vld [vmem:[%s249_s4] ss:$0 sm:$0xff]  ;;  %s255_s6 = scalar_lea.vmem [#allocation7], %s731_s29  ;;  %s174_s29 = sadd.s32 1, %s731_s29  }
  0x32   : >> { %vm579_vm2 = vcmp.gt.f32.partialorder %v180_v12, -inf  ;;  %vm197_vm5 = vmand %vm195_vm3, %vm196_vm0  ;;  %vm290_vm0 = vcmp.gt.s32.totalorder %v841_v11, %v844_v13  ;;  %v257_v51 = vld [vmem:[%s255_s6] ss:$0 sm:$0xff]  ;;  %p171_p12 = scmp.ge.s32.totalorder %s174_s29, 9  }
  0x33   : >> { %vm187_vm4 = vmand %vm183_vm1, %vm579_vm2  ;;  %vm244_vm1 = vcmp.eq.s32.totalorder %v243_v46, %v844_v13  ;;  %s400_s17 = sshrl.u32 (%p171_p12), %s776_s16, 3  ;;  %s586_s26 = sshll.u32 (%p171_p12), %s776_s16, 4 }
  0x34   : >> { %v188_v15 = vsel %vm187_vm4, %v818_v3, %v844_v13  ;;  %v189_v16 = vsel %vm187_vm4, %v180_v12, -inf  ;;  %vm865_vm2 = vmand %vm290_vm0, %vm244_vm1  ;;  %vm275_vm4 = vcmp.gt.s32.totalorder %v818_v3, %v844_v13  ;;  %s587_s27 = sshll.u32 (%p171_p12), %s400_s17, 5  ;;  %s377_s29 = scalar_lea.vmem (%p171_p12), %s965_s1, %s586_s26 }
  0x35   : >> { %vm198_vm6 = vcmp.lt.f32.partialorder %v189_v16, %v192_v14  ;;  %s734_s26 = smov (%p171_p12), [#allocation3]  }
  0x36   : >> { %vm199_vm7 = vmand %vm197_vm5, %vm198_vm6 }
  0x37   : >> { %v200_v17 = vsel %vm199_vm7, %v841_v11, %v188_v15  ;;  %v201_v18 = vsel %vm199_vm7, %v192_v14, %v189_v16  ;;  %vm279_vm6 = vmand %vm275_vm4, %vm244_vm1 }
  0x38   : >> { %v202_v19 = vrot.slane %v201_v18, 1  ;;  %v203_v20 = vrot.slane %v200_v17, 1 }
  0x3a   : >> { %vm204_vm8 = vcmp.ge.f32.partialorder %v202_v19, %v201_v18  ;;  %v207_v21 = vrot.slane %v202_v19, 1  ;;  %v208_v22 = vrot.slane %v203_v20, 1 }
  0x3b   : >> { %v205_v23 = vsel %vm204_vm8, %v202_v19, %v201_v18  ;;  %v206_v24 = vsel %vm204_vm8, %v203_v20, %v200_v17 }
  0x3c   : >> { %vm209_vm9 = vcmp.ge.f32.partialorder %v207_v21, %v205_v23  ;;  %v212_v25 = vrot.slane %v207_v21, 1  ;;  %v213_v26 = vrot.slane %v208_v22, 1 }
  0x3d   : >> { %v210_v27 = vsel %vm209_vm9, %v207_v21, %v205_v23  ;;  %v211_v28 = vsel %vm209_vm9, %v208_v22, %v206_v24 }
  0x3e   : >> { %vm214_vm10 = vcmp.ge.f32.partialorder %v212_v25, %v210_v27  ;;  %v217_v29 = vrot.slane %v212_v25, 1  ;;  %v218_v30 = vrot.slane %v213_v26, 1 }
  0x3f   : >> { %v215_v31 = vsel %vm214_vm10, %v212_v25, %v210_v27  ;;  %v216_v32 = vsel %vm214_vm10, %v213_v26, %v211_v28 }
  0x40   : >> { %vm219_vm11 = vcmp.ge.f32.partialorder %v217_v29, %v215_v31  ;;  %v222_v33 = vrot.slane %v217_v29, 1  ;;  %v223_v34 = vrot.slane %v218_v30, 1 }
  0x41   : >> { %v220_v35 = vsel %vm219_vm11, %v217_v29, %v215_v31  ;;  %v221_v36 = vsel %vm219_vm11, %v218_v30, %v216_v32 }
  0x42   : >> { %vm224_vm12 = vcmp.ge.f32.partialorder %v222_v33, %v220_v35  ;;  %v227_v37 = vrot.slane %v222_v33, 1  ;;  %v228_v38 = vrot.slane %v223_v34, 1 }
  0x43   : >> { %v225_v39 = vsel %vm224_vm12, %v222_v33, %v220_v35  ;;  %v226_v40 = vsel %vm224_vm12, %v223_v34, %v221_v36 }
  0x44   : >> { %vm229_vm13 = vcmp.ge.f32.partialorder %v227_v37, %v225_v39  ;;  %v232_v41 = vrot.slane %v227_v37, 1  ;;  %v233_v42 = vrot.slane %v228_v38, 1 }
  0x45   : >> { %v230_v43 = vsel %vm229_vm13, %v227_v37, %v225_v39  ;;  %v231_v44 = vsel %vm229_vm13, %v228_v38, %v226_v40 }
  0x46   : >> { %vm234_vm14 = vcmp.ge.f32.partialorder %v232_v41, %v230_v43 }
  0x47   : >> { %v236_v45 = vsel %vm234_vm14, %v233_v42, %v231_v44 }
  0x48   : >> { %238 = vrot.lane.b32.xlu0 %v236_v45, %s237_s30 }
  0xba   : >> { %v239_v48 = vpop.permute.xlu0 %238 }
  0xbb   : >> { %591 = vpush %v239_v48 }
  0xec   : >> { %s592_s5 = spop %591 }
  0xed   : >> { %v245_v52 = vstv %s592_s5  ;;  %s250_s8 = scalar_lea.vmem %s820_s11, %s592_s5 [#allocation1]  ;;  %s256_s10 = scalar_lea.vmem [#allocation7], %s592_s5 }
  0xee   : >> { %v247_v53 = vsel %vm244_vm1, %v245_v52, %v246_v49  ;;  %v252_v54 = vld [vmem:[%s250_s8] ss:$0 sm:$0xff]  ;;  %s911_s5 = scalar_lea.hbm (%p171_p12), %s966_s2, %s587_s27 }
  0xef   : >> { %v258_v55 = vld [vmem:[%s256_s10] ss:$0 sm:$0xff]  ;;  %248 = vst [vmem:[%s825_s19] sm:$0x1] %v247_v53  ;;  %253 = vst [vmem:[%s250_s8] sm:$0x1] %v251_v50  ;;  %vm261_vm3 = vcmp.ne.f32.partialorder %v252_v54, 0.0  ;;  %v268_v5 = vsel %vm267_vm15, %v252_v54, 0.0 }
  0xf0   : >> { %259 = vst [vmem:[%s256_s10] sm:$0x1] %v257_v51  ;;  %254 = vst [vmem:[%s249_s4] sm:$0x1] %v252_v54  ;;  %s368_s8 = scalar_lea.sflag (%p171_p12), [#allocation4], %s132_s7  ;;  %s657_s19 = sshll.u32 (%p171_p12), %s734_s26, 4  ;;  %s658_s19 = int_to_ptr.vmem [resolvable:$false] %s657_s19 }
  0xf1   : >> { %260 = vst [vmem:[%s255_s6] sm:$0x1] %v258_v55  ;;  %vm262_vm5 = vmand %vm244_vm1, %vm261_vm3  ;;  %s407_s6 = sshll.u32 (%p171_p12), %s134_s20, 4  ;;  %s408_s6 = int_to_ptr.vmem [resolvable:$true] %s407_s6 }
  0xf2   : >> { %v263_v56 = vsel %vm262_vm5, %v252_v54, 1.0  ;;  %s653_s10 = scalar_lea.vmem (%p171_p12), %s408_s6, 32  ;;  %p660_p2 = scmp.lt.s32.totalorder (%p171_p12), %s408_s6, %s658_s19 }
  0xf3   : >> { %v291_v57 = vsel %vm290_vm0, %v263_v56, 1.0  ;;  %v276_v58 = vsel %vm275_vm4, %v263_v56, 1.0  ;;  %p654_p13 = scmp.ne.s32.totalorder (%p171_p12), %s408_s6, %s653_s10 }
  0xf4   : >> { %649 = vrcp.f32 %v291_v57 }
  0xf5   : >> { %651 = vrcp.f32 %v276_v58  ;;  %p655_p0 = pnand (%p171_p12), %p654_p13, %p793_p5 }
  0xf6   : > { %v354_v14 = vld [vmem:[#allocation2] sm:$0x3] (%p171_p12) }
  0xf7   : >> { %v581_v60 = vld [vmem:[%s820_s11 + $0x8] sm:$0xff]  ;;  %v272_v63 = vld [vmem:[%s820_s11] sm:$0xff]  ;;  %356 = vst [vmem:[%s134_s20] sm:$0x3] (%p171_p12), %v354_v14  ;;  %p656_p1 = pneg (%p171_p12), %p655_p0 }
  0xf8   : > { %v301_v12 = vld [vmem:[#allocation7] sm:$0xff] (%p171_p12)  ;;  %v303_v13 = vld [vmem:[#allocation7 + $0x8] sm:$0xff] (%p171_p12) }
  0xfe   : >> { %v650_v59 = vpop.eup %649 }
  0xff   : >> { %v652_v61 = vpop.eup %651  ;;  %v293_v62 = vmul.f32 %v650_v59, %v581_v60 }
 0x100   : >> { %v278_v0 = vmul.f32 %v652_v61, %v272_v63 }
 0x101   : >> { %v295_v1 = vsel %vm865_vm2, %v293_v62, 0.0 }
 0x102   : >> { %296 = vadd.xlane.f32.xlu1 %v295_v1  ;;  %v280_v4 = vsel %vm279_vm6, %v278_v0, 0.0 }
 0x103   : >> { %281 = vadd.xlane.f32.xlu0 %v280_v4 }
 0x130   : > { %318 = vxpose.xlu0.b32.start [1/2] (short) (narrow) (%p171_p12), %v301_v12, 8 }
 0x134   : > { %319 = vxpose.xlu0.b32.end [2/2] (short) (narrow) (%p171_p12), %v303_v13, 8 }
 0x18f   : >> { %v297_v6 = vpop.xlane.xlu1 %296  ;;  %173 = sbr.rel (!%p171_p12) target bundleno = 47 (0x2f), region = 202 }
 0x190   : >> { %v298_v7 = vmul.f32 %v297_v6, %v268_v5  ;;  %v282_v8 = vpop.xlane.xlu0 %281 }
 0x191   : >> { %v283_v9 = vmul.f32 %v282_v8, %v268_v5 }
 0x192   : >> { %v299_v10 = vsub.f32 %v293_v62, %v298_v7 }
 0x193   : >> { %v284_v11 = vsub.f32 %v278_v0, %v283_v9 }
 0x194   : >> { %582 = vst [vmem:[%s820_s11 + $0x8] sm:$0xff] %v299_v10 }
 0x195   : >> { %285 = vst [vmem:[%s820_s11] sm:$0xff] %v284_v11 }
 0x19b   : > { %v392_v3 = vld [vmem:[%s820_s11 + $0x8] sm:$0xff] }
 0x19c   : > { %v390_v2 = vld [vmem:[%s820_s11] sm:$0xff]  ;;  %393 = vst [vmem:[%s377_s29 + $0x8] sm:$0xff] %v392_v3  ;;  %s659_s11 = scalar_lea.vmem %s658_s19, 64 }
 0x19d   : > { %391 = vst [vmem:[%s377_s29] sm:$0xff] %v390_v2  ;;  %p661_p3 = scmp.lt.s32.totalorder %s659_s11, %s653_s10 }
 0x19f   : > { %p662_p4 = por %p661_p3, %p660_p2 }
 0x1a1   : > { %p663_p8 = pnand %p662_p4, %p656_p1 }
 0x1a3   : > { %666 = shalt.err (!%p663_p8)
}
 0x1a4   : > { %s667_s7 = scalar_lea.hbm %s911_s5, 32  ;;  %s671_s28 = scalar_lea.hbm %s966_s2, 32 }
 0x1a5   : > { %p668_p9 = scmp.ne.s32.totalorder %s911_s5, %s667_s7  ;;  %p672_p12 = scmp.lt.u32.totalorder %s911_s5, %s966_s2 }
 0x1a6   : > { %p673_p13 = scmp.lt.u32.totalorder %s671_s28, %s667_s7  ;;  %p675_p1 = scmp.lt.u32.totalorder %s667_s7, %s911_s5 }
 0x1a7   : > { %p669_p10 = pnand %p668_p9, %p793_p5 }
 0x1a8   : > { %p674_p0 = por %p673_p13, %p672_p12 }
 0x1a9   : > { %p670_p11 = pneg %p669_p10 }
 0x1aa   : > { %p676_p2 = por %p675_p1, %p674_p0 }
 0x1ac   : > { %p677_p3 = pnand %p676_p2, %p670_p11 }
 0x1ae   : > { %680 = shalt.err (!%p677_p3)
}
 0x1af   : > { %593 = dma.vmem_to_hbm [thread:$0]  (%p793_p5), %s408_s6, 32, %s911_s5, %s368_s8  }
 0x1b0   : > { %v334_v15 = vpop.trf.xlu0  ;;  %s588_s4 = sshll.u32 (%p793_p5), %s400_s17, 1 }
 0x1b1   : > { %350 = vst [vmem:[%s830_s22] sm:$0x1] %v334_v15  ;;  %s416_s19 = scalar_lea.vmem (%p793_p5), %s967_s3, %s588_s4 }
 0x1b3   : > { %413 = sbr.rel (!%p793_p5) target bundleno = 450 (0x1c2), region = 80 }
 0x1b8   : > { %v360_v16 = vld [vmem:[#allocation5] sm:$0x3] }
 0x1b9   : > { %362 = vst [vmem:[%s140_s21] sm:$0x3] %v360_v16 }
 0x1c0   : > { %v432_v17 = vld [vmem:[%s140_s21] sm:$0x3] }
 0x1c1   : > { %433 = vst [vmem:[%s416_s19] sm:$0x3] %v432_v17 }
 0x1c2 PF: > { %s460_s22 = sand.u32 1, %s711_s12   ;;  %p596_p5 = pnand %p567_p7, %p797_p6 }
 0x1c3   : > { %s461_s24 = scalar_lea.sflag [#allocation4], %s460_s22 }
 0x1c4   : > { %706 = dma.done.wait (!%p596_p5), %s461_s24, 32  }
 0x1c5   : > { %708 = vsyncadd (!%p596_p5), %s461_s24, 4294967264  ;;  %p10_p4 = scmp.ge.s32.totalorder %s780_s18, 4   ;;  %s972_s12 = smov %s715_s13 }
 0x1c6   : > { %s973_s13 = smov %s719_s14  ;;  %s974_s14 = smov %s791_s23 }
 0x1c7   : > { %s975_s15 = smov %s780_s18  ;;  %12 = sbr.rel (!%p10_p4) target bundleno = 3 (0x3), region = 213 }
 0x1ce   :  { %473 = vsyncpa [#allocation4], 1 }
 0x1cf   :  { %475 = vsyncpa [#allocation4 + $0x1], 1 }

// kernel: custom-call.28
= control target key start
LH: loop header
LB: loop body
LE: loop exit
PB: predicated region body
PF: predicated region fallthrough
CT: control target
= control target key end

     0   :  { %s454_s6 = smov 0   ;;  %s456_s7 = smov 0   ;;  %s528_s0 = inlined_call_operand.vmem [shape: f32[2,1,9,9], index: 0, kind: input, shape index: {}]   ;;  %s529_s1 = inlined_call_operand.vmem [shape: f32[2,1,9,9], index: 1, kind: output, shape index: {}]  }
   0x1   :  { %s458_s8 = smov 0  }
   0x2 LB: > { %s370_s9 = sadd.s32 4294967295, %s440_s8   ;;  %s33_s10 = sadd.s32 1, %s436_s7  ;;  %s440_s8 = sphi %s458_s8, %s7_s8   ;;  %s436_s7 = sphi %s456_s7, %s531_s7   ;;  %s432_s6 = sphi %s454_s6, %s530_s6  }
   0x3   : > { %p35_p0 = scmp.ge.s32.totalorder %s33_s10, 2  ;;  %p372_p1 = scmp.ge.s32.totalorder %s440_s8, 2 }
   0x4   : > { %s49_s11 = sand.u32 (!%p372_p1), 1, %s440_s8   ;;  %s386_s12 = sshll.u32 (!%p372_p1), %s436_s7, 4 }
   0x5   : > { %s533_s10 = smov (%p35_p0, %s33_s10), 0  ;;  %47 = sbr.rel (%p372_p1) target bundleno = 12 (0xc), region = 16 }
   0x6   : > { %s373_s13 = sshll.u32 (!%p372_p1), %s49_s11, 4  ;;  %s58_s16 = scalar_lea.vmem (!%p372_p1), %s528_s0, %s386_s12 }
   0x7   : > { %v88_v0 = vld [vmem:[%s58_s16] sm:$0xff] (!%p372_p1)  ;;  %v90_v1 = vld [vmem:[%s58_s16 + $0x8] sm:$0xff] (!%p372_p1)  ;;  %s51_s17 = scalar_lea.vmem (!%p372_p1), [#allocation0], %s373_s13 }
   0x8   : > { %89 = vst [vmem:[%s51_s17] sm:$0xff] (!%p372_p1), %v88_v0  ;;  %91 = vst [vmem:[%s51_s17 + $0x8] sm:$0xff] (!%p372_p1), %v90_v1 }
   0xc PF: > { %p376_p2 = scmp.ge.s32.totalorder %s440_s8, 1  ;;  %p96_p3 = scmp.lt.s32.totalorder %s440_s8, 3 }
   0xe   : > { %p97_p4 = pnand %p376_p2, %p96_p3 }
  0x10   : > { %100 = sbr.rel (%p97_p4) target bundleno = 1358 (0x54e), region = 54 }
  0x17   : > { %s103_s18 = sand.u32 1, %s370_s9   ;;  %v114_v2 = vlaneseq  ;;  %v442_v11 = vmov -1.0   ;;  %v443_v55 = vmov 0.0   ;;  %s387_s21 = sshll.u32 %s432_s6, 4 }
  0x18   : > { %s377_s19 = sshll.u32 %s103_s18, 4  ;;  %s270_s24 = scalar_lea.vmem %s529_s1, %s387_s21 }
  0x19   : > { %v481_v3 = vand.u32 127, %v114_v2  ;;  %v118_v4 = vshrl.u32 %v114_v2, 7  ;;  %s483_s20 = scalar_lea.vmem [#allocation0], %s377_s19 }
  0x1a   : > { %v121_v5 = vld [vmem:[%s483_s20] sm:$0xff]  ;;  %v379_v38 = vld [vmem:[%s483_s20 + $0x8] sm:$0xff] }
  0x1b   : > { %vm120_vm0 = vcmp.eq.s32.totalorder %v118_v4, %v481_v3  ;;  %vm116_vm1 = vcmp.lt.s32.totalorder %v481_v3, 9  ;;  %vm125_vm2 = vcmp.ge.s32.totalorder %v118_v4, %v481_v3  ;;  %vm155_vm4 = vcmp.eq.s32.totalorder %v481_v3, 0 }
  0x1c   : > { %v122_v6 = vsel %vm120_vm0, %v121_v5, 0.0  ;;  %vm126_vm3 = vmand %vm125_vm2, %vm116_vm1  ;;  %vm152_vm5 = vcmp.eq.s32.totalorder %v481_v3, %v118_v4  ;;  %v156_v12 = vsel %vm155_vm4, 1.0, %v442_v11  ;;  %vm170_vm6 = vcmp.eq.s32.totalorder %v481_v3, 1 }
  0x1d   : > { %123 = vadd.xlane.f32.xlu0 %v122_v6  ;;  %v127_v8 = vsel %vm126_vm3, %v121_v5, 0.0  ;;  %v157_v13 = vsel %vm152_vm5, %v156_v12, 0.0  ;;  %vm180_vm7 = vcmp.eq.s32.totalorder %v481_v3, 2  ;;  %vm190_vm8 = vcmp.eq.s32.totalorder %v481_v3, 3 }
  0x1e   : > { %vm200_vm9 = vcmp.eq.s32.totalorder %v481_v3, 4  ;;  %v135_v33 = vadd.s32 8, %v118_v4  ;;  %vm210_vm11 = vcmp.eq.s32.totalorder %v481_v3, 5  ;;  %vm220_vm14 = vcmp.eq.s32.totalorder %v481_v3, 6 }
  0x1f   : > { %vm230_vm0 = vcmp.eq.s32.totalorder %v481_v3, 7 }
  0x20   : > { %vm136_vm10 = vcmp.eq.s32.totalorder %v135_v33, %v481_v3  ;;  %vm141_vm12 = vcmp.ge.s32.totalorder %v135_v33, %v481_v3  ;;  %vm163_vm15 = vcmp.eq.s32.totalorder %v481_v3, %v135_v33 }
  0x21   : > { %v138_v39 = vsel %vm136_vm10, %v379_v38, 0.0  ;;  %vm142_vm13 = vmand %vm141_vm12, %vm116_vm1  ;;  %v164_v56 = vsel %vm163_vm15, -1.0, %v443_v55  ;;  %vm240_vm1 = vcmp.eq.s32.totalorder %v481_v3, 8 }
  0x22   : > { %v143_v46 = vsel %vm142_vm13, %v379_v38, 0.0 }
  0xaa   : > { %v487_v7 = vpop.xlane.xlu0 %123 }
  0xab   : > { %414 = vrcp.f32 %v487_v7  ;;  %vm251_vm3 = vweird.f32 %v487_v7 }
  0xb5   : > { %v494_v9 = vpop.eup %414 }
  0xb6   : > { %v129_v10 = vmul.f32 %v494_v9, %v127_v8 }
  0xb8   : > { %130 = vst [vmem:[#allocation2] sm:$0xff] %v129_v10 }
  0xbf   : > { %v166_v14 = vld [vmem:[#allocation2 + $0x1] ss:$0 sm:$0xff]  ;;  %v176_v17 = vld [vmem:[#allocation2 + $0x2] ss:$0 sm:$0xff]  ;;  %v186_v22 = vld [vmem:[#allocation2 + $0x3] ss:$0 sm:$0xff] }
  0xc0   : > { %v167_v15 = vxor.u32 2147483648, %v166_v14  ;;  %v177_v19 = vxor.u32 2147483648, %v176_v17  ;;  %v187_v24 = vxor.u32 2147483648, %v186_v22  ;;  %v196_v27 = vld [vmem:[#allocation2 + $0x4] ss:$0 sm:$0xff] }
  0xc1   : > { %v197_v29 = vxor.u32 2147483648, %v196_v27  ;;  %v206_v32 = vld [vmem:[#allocation2 + $0x5] ss:$0 sm:$0xff]  ;;  %v216_v40 = vld [vmem:[#allocation2 + $0x6] ss:$0 sm:$0xff] }
  0xc2   : > { %v171_v16 = vmul.f32 %v167_v15, %v157_v13  ;;  %v207_v35 = vxor.u32 2147483648, %v206_v32  ;;  %v217_v42 = vxor.u32 2147483648, %v216_v40  ;;  %v226_v49 = vld [vmem:[#allocation2 + $0x7] ss:$0 sm:$0xff] }
  0xc3   : > { %v227_v52 = vxor.u32 2147483648, %v226_v49 }
  0xc4   : > { %172 = vadd.xlane.f32.xlu0 %v171_v16 }
 0x151   : > { %v173_v18 = vpop.xlane.xlu0 %172 }
 0x152   : > { %v174_v20 = vsel %vm170_vm6, %v173_v18, %v157_v13 }
 0x153   : > { %v181_v21 = vmul.f32 %v177_v19, %v174_v20 }
 0x155   : > { %182 = vadd.xlane.f32.xlu1 %v181_v21 }
 0x1e2   : > { %v183_v23 = vpop.xlane.xlu1 %182 }
 0x1e3   : > { %v184_v25 = vsel %vm180_vm7, %v183_v23, %v174_v20 }
 0x1e4   : > { %v191_v26 = vmul.f32 %v187_v24, %v184_v25 }
 0x1e6   : > { %192 = vadd.xlane.f32.xlu1 %v191_v26 }
 0x273   : > { %v193_v28 = vpop.xlane.xlu1 %192 }
 0x274   : > { %v194_v30 = vsel %vm190_vm8, %v193_v28, %v184_v25 }
 0x275   : > { %v201_v31 = vmul.f32 %v197_v29, %v194_v30 }
 0x277   : > { %202 = vadd.xlane.f32.xlu0 %v201_v31 }
 0x304   : > { %v203_v34 = vpop.xlane.xlu0 %202 }
 0x305   : > { %v204_v36 = vsel %vm200_vm9, %v203_v34, %v194_v30 }
 0x306   : > { %v211_v37 = vmul.f32 %v207_v35, %v204_v36 }
 0x308   : > { %212 = vadd.xlane.f32.xlu1 %v211_v37 }
 0x30c   : > { %139 = vadd.xlane.f32.xlu1 %v138_v39 }
 0x395   : > { %v213_v41 = vpop.xlane.xlu1 %212 }
 0x396   : > { %v214_v43 = vsel %vm210_vm11, %v213_v41, %v204_v36 }
 0x397   : > { %v221_v44 = vmul.f32 %v217_v42, %v214_v43 }
 0x399   : > { %222 = vadd.xlane.f32.xlu0 %v221_v44  ;;  %v140_v45 = vpop.xlane.xlu1 %139 }
 0x39a   : > { %416 = vrcp.f32 %v140_v45  ;;  %vm256_vm2 = vweird.f32 %v140_v45 }
 0x3a4   : > { %v417_v47 = vpop.eup %416 }
 0x3a5   : > { %v145_v48 = vmul.f32 %v417_v47, %v143_v46 }
 0x3a7   : > { %146 = vst [vmem:[#allocation2 + $0x8] sm:$0xff] %v145_v48 }
 0x3ae   : > { %v236_v50 = vld [vmem:[#allocation2 + $0x8] ss:$0 sm:$0xff] }
 0x3af   : > { %v237_v53 = vxor.u32 2147483648, %v236_v50 }
 0x3b1   : > { %v245_v58 = vmul.f32 %v237_v53, %v164_v56 }
 0x426   : > { %v223_v51 = vpop.xlane.xlu0 %222 }
 0x427   : > { %v224_v54 = vsel %vm220_vm14, %v223_v51, %v214_v43 }
 0x428   : > { %v231_v57 = vmul.f32 %v227_v52, %v224_v54 }
 0x42a   : > { %232 = vadd.xlane.f32.xlu0 %v231_v57 }
 0x42e   : > { %246 = vadd.xlane.f32.xlu0 %v245_v58 }
 0x4b7   : > { %v233_v59 = vpop.xlane.xlu0 %232 }
 0x4b8   : > { %v234_v60 = vsel %vm230_vm0, %v233_v59, %v224_v54 }
 0x4b9   : > { %v241_v61 = vmul.f32 %v237_v53, %v234_v60 }
 0x4bb   : > { %v247_v62 = vpop.xlane.xlu0 %246  ;;  %242 = vadd.xlane.f32.xlu1 %v241_v61 }
 0x4bc   : > { %v248_v63 = vsel %vm240_vm1, %v247_v62, %v164_v56 }
 0x4bd   : > { %v255_v0 = vmul.f32 %v417_v47, %v248_v63 }
 0x4bf   : > { %v257_v1 = vsel %vm256_vm2, %v248_v63, %v255_v0 }
 0x4c0   : > { %303 = vst [vmem:[%s270_s24 + $0x8] sm:$0xff] %v257_v1 }
 0x548   : > { %v243_v2 = vpop.xlane.xlu1 %242 }
 0x549   : > { %v244_v4 = vsel %vm240_vm1, %v243_v2, %v234_v60 }
 0x54a   : > { %v250_v5 = vmul.f32 %v494_v9, %v244_v4 }
 0x54c   : > { %v252_v3 = vsel %vm251_vm3, %v244_v4, %v250_v5 }
 0x54d   : > { %301 = vst [vmem:[%s270_s24] sm:$0xff] %v252_v3 }
 0x54e PF: > { %s7_s8 = sadd.s32 1, %s440_s8   ;;  %s530_s6 = smov %s436_s7 }
 0x54f   : > { %p4_p5 = scmp.ge.s32.totalorder %s7_s8, 4   ;;  %s531_s7 = smov %s533_s10 }
 0x551   :  { %6 = sbr.rel (!%p4_p5) target bundleno = 2 (0x2), region = 129 }

// kernel: custom-call.27
= control target key start
LH: loop header
LB: loop body
LE: loop exit
PB: predicated region body
PF: predicated region fallthrough
CT: control target
= control target key end

     0   :  { %s481_s6 = smov 0   ;;  %s483_s7 = smov 0   ;;  %s554_s0 = inlined_call_operand.vmem [shape: f32[2,1,9,9], index: 0, kind: input, shape index: {}]   ;;  %s555_s1 = inlined_call_operand.vmem [shape: f32[2,1,9,9], index: 1, kind: output, shape index: {}]  }
   0x1   :  { %s485_s8 = smov 0  }
   0x2 LB: > { %s397_s9 = sadd.s32 4294967295, %s467_s8   ;;  %s33_s10 = sadd.s32 1, %s463_s7  ;;  %s467_s8 = sphi %s485_s8, %s7_s8   ;;  %s463_s7 = sphi %s483_s7, %s557_s7   ;;  %s459_s6 = sphi %s481_s6, %s556_s6  }
   0x3   : > { %p35_p0 = scmp.ge.s32.totalorder %s33_s10, 2  ;;  %p399_p1 = scmp.ge.s32.totalorder %s467_s8, 2 }
   0x4   : > { %s49_s11 = sand.u32 (!%p399_p1), 1, %s467_s8   ;;  %s413_s12 = sshll.u32 (!%p399_p1), %s463_s7, 4 }
   0x5   : > { %s559_s10 = smov (%p35_p0, %s33_s10), 0  ;;  %47 = sbr.rel (%p399_p1) target bundleno = 12 (0xc), region = 16 }
   0x6   : > { %s400_s13 = sshll.u32 (!%p399_p1), %s49_s11, 4  ;;  %s58_s16 = scalar_lea.vmem (!%p399_p1), %s554_s0, %s413_s12 }
   0x7   : > { %v88_v0 = vld [vmem:[%s58_s16] sm:$0xff] (!%p399_p1)  ;;  %v90_v1 = vld [vmem:[%s58_s16 + $0x8] sm:$0xff] (!%p399_p1)  ;;  %s51_s17 = scalar_lea.vmem (!%p399_p1), [#allocation0], %s400_s13 }
   0x8   : > { %89 = vst [vmem:[%s51_s17] sm:$0xff] (!%p399_p1), %v88_v0  ;;  %91 = vst [vmem:[%s51_s17 + $0x8] sm:$0xff] (!%p399_p1), %v90_v1 }
   0xc PF: > { %p403_p2 = scmp.ge.s32.totalorder %s467_s8, 1  ;;  %p96_p3 = scmp.lt.s32.totalorder %s467_s8, 3 }
   0xe   : > { %p97_p4 = pnand %p403_p2, %p96_p3 }
  0x10   : > { %100 = sbr.rel (%p97_p4) target bundleno = 1358 (0x54e), region = 54 }
  0x17   : > { %s103_s18 = sand.u32 1, %s397_s9   ;;  %v114_v2 = vlaneseq  ;;  %v469_v12 = vmov -1.0   ;;  %v470_v16 = vmov 0.0   ;;  %s414_s21 = sshll.u32 %s459_s6, 4 }
  0x18   : > { %s404_s19 = sshll.u32 %s103_s18, 4  ;;  %s297_s24 = scalar_lea.vmem %s555_s1, %s414_s21 }
  0x19   : > { %v508_v3 = vand.u32 127, %v114_v2  ;;  %v118_v4 = vshrl.u32 %v114_v2, 7  ;;  %s510_s20 = scalar_lea.vmem [#allocation0], %s404_s19 }
  0x1a   : > { %v121_v5 = vld [vmem:[%s510_s20] sm:$0xff] }
  0x1b   : > { %vm116_vm0 = vcmp.lt.s32.totalorder %v508_v3, 9  ;;  %vm120_vm1 = vcmp.eq.s32.totalorder %v118_v4, %v508_v3  ;;  %vm125_vm2 = vcmp.le.s32.totalorder %v118_v4, %v508_v3  ;;  %v522_v11 = vadd.s32 8, %v118_v4 }
  0x1c   : > { %v122_v6 = vsel %vm120_vm1, %v121_v5, 0.0  ;;  %vm126_vm3 = vmand %vm125_vm2, %vm116_vm0  ;;  %vm162_vm4 = vcmp.eq.s32.totalorder %v508_v3, 8  ;;  %vm152_vm6 = vcmp.eq.s32.totalorder %v508_v3, %v118_v4  ;;  %vm170_vm7 = vcmp.eq.s32.totalorder %v508_v3, 7 }
  0x1d   : > { %v127_v7 = vsel %vm126_vm3, %v121_v5, 0.0  ;;  %123 = vadd.xlane.f32.xlu0 %v122_v6  ;;  %vm159_vm5 = vcmp.eq.s32.totalorder %v508_v3, %v522_v11  ;;  %v163_v13 = vsel %vm162_vm4, 1.0, %v469_v12  ;;  %v153_v17 = vsel %vm152_vm6, -1.0, %v470_v16  ;;  %v406_v6 = vld [vmem:[%s510_s20 + $0x8] sm:$0xff] }
  0x1e   : > { %v164_v14 = vsel %vm159_vm5, %v163_v13, 0.0  ;;  %vm184_vm8 = vcmp.eq.s32.totalorder %v508_v3, 6  ;;  %vm198_vm9 = vcmp.eq.s32.totalorder %v508_v3, 5  ;;  %vm212_vm10 = vcmp.eq.s32.totalorder %v508_v3, 4 }
  0x1f   : > { %vm226_vm11 = vcmp.eq.s32.totalorder %v508_v3, 3  ;;  %vm240_vm12 = vcmp.eq.s32.totalorder %v508_v3, 2  ;;  %vm136_vm13 = vcmp.eq.s32.totalorder %v522_v11, %v508_v3  ;;  %vm254_vm14 = vcmp.eq.s32.totalorder %v508_v3, 1 }
  0x20   : > { %vm267_vm15 = vcmp.eq.s32.totalorder %v508_v3, 0 }
  0xaa   : > { %v516_v8 = vpop.xlane.xlu0 %123 }
  0xab   : > { %441 = vrcp.f32 %v516_v8  ;;  %vm278_vm0 = vweird.f32 %v516_v8 }
  0xb5   : > { %v519_v9 = vpop.eup %441 }
  0xb6   : > { %v129_v10 = vmul.f32 %v519_v9, %v127_v7  ;;  %v138_v7 = vsel %vm136_vm13, %v406_v6, 0.0 }
  0xb8   : > { %130 = vst [vmem:[#allocation2] sm:$0xff] %v129_v10 }
  0xbf   : > { %v166_v15 = vld [vmem:[#allocation2 + $0x7] ss:$0 sm:$0xff]  ;;  %v180_v21 = vld [vmem:[#allocation2 + $0x6] ss:$0 sm:$0xff]  ;;  %v194_v29 = vld [vmem:[#allocation2 + $0x5] ss:$0 sm:$0xff] }
  0xc0   : > { %v167_v18 = vxor.u32 2147483648, %v166_v15  ;;  %v181_v24 = vxor.u32 2147483648, %v180_v21  ;;  %v195_v32 = vxor.u32 2147483648, %v194_v29  ;;  %v208_v37 = vld [vmem:[#allocation2 + $0x4] ss:$0 sm:$0xff] }
  0xc1   : > { %v209_v40 = vxor.u32 2147483648, %v208_v37  ;;  %v222_v45 = vld [vmem:[#allocation2 + $0x3] ss:$0 sm:$0xff]  ;;  %v236_v53 = vld [vmem:[#allocation2 + $0x2] ss:$0 sm:$0xff] }
  0xc2   : > { %v175_v19 = vmul.f32 %v167_v18, %v164_v14  ;;  %v171_v20 = vmul.f32 %v167_v18, %v153_v17  ;;  %v223_v48 = vxor.u32 2147483648, %v222_v45  ;;  %v237_v56 = vxor.u32 2147483648, %v236_v53  ;;  %v250_v61 = vld [vmem:[#allocation2 + $0x1] ss:$0 sm:$0xff]  ;;  %v263_v10 = vld [vmem:[#allocation2] ss:$0 sm:$0xff] }
  0xc3   : > { %v251_v0 = vxor.u32 2147483648, %v250_v61 }
  0xc4   : > { %176 = vadd.xlane.f32.xlu1 %v175_v19  ;;  %172 = vadd.xlane.f32.xlu0 %v171_v20 }
 0x151   : > { %v177_v22 = vpop.xlane.xlu1 %176  ;;  %v173_v23 = vpop.xlane.xlu0 %172 }
 0x152   : > { %v178_v25 = vsel %vm170_vm7, %v177_v22, %v164_v14  ;;  %v174_v26 = vsel %vm170_vm7, %v173_v23, %v153_v17  ;;  %v264_v14 = vxor.u32 2147483648, %v263_v10 }
 0x153   : > { %v189_v27 = vmul.f32 %v181_v24, %v178_v25  ;;  %v185_v28 = vmul.f32 %v181_v24, %v174_v26 }
 0x155   : > { %190 = vadd.xlane.f32.xlu0 %v189_v27  ;;  %186 = vadd.xlane.f32.xlu1 %v185_v28 }
 0x1e2   : > { %v187_v30 = vpop.xlane.xlu1 %186  ;;  %v191_v31 = vpop.xlane.xlu0 %190 }
 0x1e3   : > { %v188_v33 = vsel %vm184_vm8, %v187_v30, %v174_v26  ;;  %v192_v34 = vsel %vm184_vm8, %v191_v31, %v178_v25 }
 0x1e4   : > { %v199_v35 = vmul.f32 %v195_v32, %v188_v33  ;;  %v203_v36 = vmul.f32 %v195_v32, %v192_v34 }
 0x1e6   : > { %200 = vadd.xlane.f32.xlu1 %v199_v35  ;;  %204 = vadd.xlane.f32.xlu0 %v203_v36 }
 0x273   : > { %v201_v38 = vpop.xlane.xlu1 %200  ;;  %v205_v39 = vpop.xlane.xlu0 %204 }
 0x274   : > { %v202_v41 = vsel %vm198_vm9, %v201_v38, %v188_v33  ;;  %v206_v42 = vsel %vm198_vm9, %v205_v39, %v192_v34 }
 0x275   : > { %v213_v43 = vmul.f32 %v209_v40, %v202_v41  ;;  %v217_v44 = vmul.f32 %v209_v40, %v206_v42 }
 0x277   : > { %214 = vadd.xlane.f32.xlu1 %v213_v43  ;;  %218 = vadd.xlane.f32.xlu0 %v217_v44 }
 0x304   : > { %v215_v46 = vpop.xlane.xlu1 %214  ;;  %v219_v47 = vpop.xlane.xlu0 %218 }
 0x305   : > { %v216_v49 = vsel %vm212_vm10, %v215_v46, %v202_v41  ;;  %v220_v50 = vsel %vm212_vm10, %v219_v47, %v206_v42 }
 0x306   : > { %v227_v51 = vmul.f32 %v223_v48, %v216_v49  ;;  %v231_v52 = vmul.f32 %v223_v48, %v220_v50 }
 0x308   : > { %228 = vadd.xlane.f32.xlu1 %v227_v51  ;;  %232 = vadd.xlane.f32.xlu0 %v231_v52 }
 0x395   : > { %v229_v54 = vpop.xlane.xlu1 %228  ;;  %v233_v55 = vpop.xlane.xlu0 %232 }
 0x396   : > { %v230_v57 = vsel %vm226_vm11, %v229_v54, %v216_v49  ;;  %v234_v58 = vsel %vm226_vm11, %v233_v55, %v220_v50 }
 0x397   : > { %v241_v59 = vmul.f32 %v237_v56, %v230_v57  ;;  %v245_v60 = vmul.f32 %v237_v56, %v234_v58 }
 0x399   : > { %242 = vadd.xlane.f32.xlu1 %v241_v59  ;;  %246 = vadd.xlane.f32.xlu0 %v245_v60 }
 0x426   : > { %v243_v62 = vpop.xlane.xlu1 %242  ;;  %v247_v63 = vpop.xlane.xlu0 %246 }
 0x427   : > { %v244_v1 = vsel %vm240_vm12, %v243_v62, %v230_v57  ;;  %v248_v2 = vsel %vm240_vm12, %v247_v63, %v234_v58 }
 0x428   : > { %v255_v4 = vmul.f32 %v251_v0, %v244_v1  ;;  %v259_v5 = vmul.f32 %v251_v0, %v248_v2 }
 0x42a   : > { %256 = vadd.xlane.f32.xlu1 %v255_v4  ;;  %260 = vadd.xlane.f32.xlu0 %v259_v5 }
 0x42e   : > { %139 = vadd.xlane.f32.xlu1 %v138_v7 }
 0x4b7   : > { %v257_v12 = vpop.xlane.xlu1 %256  ;;  %v261_v13 = vpop.xlane.xlu0 %260 }
 0x4b8   : > { %v258_v15 = vsel %vm254_vm14, %v257_v12, %v244_v1  ;;  %v262_v16 = vsel %vm254_vm14, %v261_v13, %v248_v2 }
 0x4b9   : > { %v268_v17 = vmul.f32 %v264_v14, %v258_v15  ;;  %v272_v18 = vmul.f32 %v264_v14, %v262_v16 }
 0x4bb   : > { %269 = vadd.xlane.f32.xlu0 %v268_v17  ;;  %273 = vadd.xlane.f32.xlu1 %v272_v18  ;;  %v140_v19 = vpop.xlane.xlu1 %139 }
 0x4bc   : > { %443 = vrcp.f32 %v140_v19  ;;  %vm283_vm1 = vweird.f32 %v140_v19 }
 0x4c6   : > { %v444_v11 = vpop.eup %443 }
 0x548   : > { %v274_v20 = vpop.xlane.xlu1 %273  ;;  %v270_v21 = vpop.xlane.xlu0 %269 }
 0x549   : > { %v275_v22 = vsel %vm267_vm15, %v274_v20, %v262_v16  ;;  %v271_v23 = vsel %vm267_vm15, %v270_v21, %v258_v15 }
 0x54a   : > { %v282_v24 = vmul.f32 %v444_v11, %v275_v22  ;;  %v277_v25 = vmul.f32 %v519_v9, %v271_v23 }
 0x54c   : > { %v284_v26 = vsel %vm283_vm1, %v275_v22, %v282_v24  ;;  %v279_v27 = vsel %vm278_vm0, %v271_v23, %v277_v25 }
 0x54d   : > { %330 = vst [vmem:[%s297_s24 + $0x8] sm:$0xff] %v284_v26  ;;  %328 = vst [vmem:[%s297_s24] sm:$0xff] %v279_v27 }
 0x54e PF: > { %s7_s8 = sadd.s32 1, %s467_s8   ;;  %s556_s6 = smov %s463_s7 }
 0x54f   : > { %p4_p5 = scmp.ge.s32.totalorder %s7_s8, 4   ;;  %s557_s7 = smov %s559_s10 }
 0x551   :  { %6 = sbr.rel (!%p4_p5) target bundleno = 2 (0x2), region = 128 }

// kernel: sub.78
= control target key start
LH: loop header
LB: loop body
LE: loop exit
PB: predicated region body
PF: predicated region fallthrough
CT: control target
= control target key end

     0   :  { %s56_s0 = inlined_call_operand.vmem [shape: f32[2,3,2], index: 0, kind: input, shape index: {}]   ;;  %s57_s1 = inlined_call_operand.vmem [shape: f32[2,3,2], index: 1, kind: input, shape index: {}]   ;;  %s58_s2 = inlined_call_operand.vmem [shape: f32[2,3,2], index: 2, kind: output, shape index: {}]  }
   0x1   :  { %v3_v0 = vld [vmem:[%s56_s0] sm:$0x7]  ;;  %v20_v2 = vld [vmem:[%s56_s0 + $0x4] sm:$0x7] }
   0x2   :  { %v4_v1 = vld [vmem:[%s57_s1] sm:$0x7]  ;;  %v21_v4 = vld [vmem:[%s57_s1 + $0x4] sm:$0x7] }
   0x3   :  { %v7_v3 = vsub.f32 %v3_v0, %v4_v1  ;;  %v16_v5 = vsub.f32 %v20_v2, %v21_v4 }
   0x5   :  { %9 = vst [vmem:[%s58_s2] sm:$0xf] %v7_v3  ;;  %22 = vst [vmem:[%s58_s2 + $0x4] sm:$0xf] %v16_v5 }

// kernel: forward.2
= control target key start
LH: loop header
LB: loop body
LE: loop exit
PB: predicated region body
PF: predicated region fallthrough
CT: control target
= control target key end

     0   :  { %v76_v0 = vlaneseq  ;;  %vm56_vm0 = vcmask 80896   ;;  %v352_v2 = vmov 0.0   ;;  %v353_v4 = vmov 0   ;;  %s465_s1 = inlined_call_operand.vmem [shape: f32[2,1,256], index: 1, kind: input, shape index: {}]   ;;  %s466_s0 = inlined_call_operand.vmem [shape: f32[2,10,256], index: 0, kind: input, shape index: {}]   ;;  %s467_s2 = inlined_call_operand.vmem [shape: f32[1,2,10,10], index: 2, kind: output, shape index: {}]  }
   0x1   :  { %v70_v1 = vld [vmem:[%s465_s1] sm:$0x3]  ;;  %57 = vst.msk [vmem:[#allocation2] sm:$0xff] %vm56_vm0, %v352_v2  ;;  %60 = vst.msk [vmem:[#allocation2 + $0x10] sm:$0xff] %vm56_vm0, %v352_v2  ;;  %v71_v6 = vld [vmem:[%s465_s1 + $0x2] sm:$0x3] }
   0x2   :  { %vm72_vm1 = vcmp.gt.f32.partialorder %v70_v1, 0.0  ;;  %v77_v3 = vshrl.u32 %v76_v0, 7  ;;  %vm73_vm2 = vcmp.gt.f32.partialorder %v71_v6, 0.0  ;;  %v63_v9 = vld [vmem:[%s466_s0 + $0x8] sm:$0xff]  ;;  %v65_v10 = vld [vmem:[%s466_s0 + $0x18] sm:$0x3] }
   0x3   :  { %v104_v5 = vsel %vm72_vm1, 1, %v353_v4  ;;  %v67_v11 = vld [vmem:[%s466_s0 + $0x28] sm:$0xff]  ;;  %v105_v12 = vsel %vm73_vm2, 1, %v353_v4  ;;  %v69_v15 = vld [vmem:[%s466_s0 + $0x38] sm:$0x3]  ;;  %v62_v18 = vld [vmem:[%s466_s0] sm:$0xff] }
   0x4   :  { %v82_v7 = vsub.s32 1, %v77_v3  ;;  %v78_v8 = vsub.s32 0, %v77_v3  ;;  %v64_v19 = vld [vmem:[%s466_s0 + $0x10] sm:$0x3]  ;;  %v66_v22 = vld [vmem:[%s466_s0 + $0x20] sm:$0xff]  ;;  %vm58_vm11 = vcmask 74752  }
   0x5   :  { %v68_v23 = vld [vmem:[%s466_s0 + $0x30] sm:$0x3]  ;;  %59 = vst.msk [vmem:[#allocation2 + $0x8] sm:$0x3] %vm58_vm11, %v352_v2  ;;  %61 = vst.msk [vmem:[#allocation2 + $0x18] sm:$0x3] %vm58_vm11, %v352_v2 }
   0x6   :  { %v83_v13 = vrot.slane %v70_v1, %v82_v7  ;;  %v113_v14 = vrot.slane %v104_v5, %v82_v7  ;;  %v91_v16 = vrot.slane %v71_v6, %v82_v7  ;;  %v121_v17 = vrot.slane %v105_v12, %v82_v7 }
   0x7   :  { %v79_v20 = vrot.slane %v70_v1, %v78_v8  ;;  %v109_v21 = vrot.slane %v104_v5, %v78_v8  ;;  %v87_v24 = vrot.slane %v71_v6, %v78_v8  ;;  %v117_v25 = vrot.slane %v105_v12, %v78_v8 }
   0x8   :  { %v97_v26 = vmul.f32 %v83_v13, %v63_v9  ;;  %v99_v27 = vmul.f32 %v83_v13, %v65_v10  ;;  %vm403_vm3 = vcmp.eq.s32.totalorder %v113_v14, 1  ;;  %v101_v29 = vmul.f32 %v91_v16, %v67_v11  ;;  %v134_v41 = vld [vmem:[#allocation2] sm:$0xff]  ;;  %v136_v42 = vld [vmem:[#allocation2 + $0x10] sm:$0xff] }
   0x9   :  { %vm339_vm4 = vmpackc.low %vm403_vm3, %vm403_vm3  ;;  %v103_v30 = vmul.f32 %v91_v16, %v69_v15  ;;  %vm410_vm5 = vcmp.eq.s32.totalorder %v121_v17, 1  ;;  %v96_v32 = vmul.f32 %v79_v20, %v62_v18  ;;  %v98_v33 = vmul.f32 %v79_v20, %v64_v19 }
   0xa   :  { %v338_v34 = vpack.c.bf16 %v99_v27, %v97_v26  ;;  %vm345_vm6 = vmpackc.low %vm410_vm5, %vm410_vm5  ;;  %vm417_vm7 = vcmp.eq.s32.totalorder %v109_v21, 1  ;;  %v100_v36 = vmul.f32 %v87_v24, %v66_v22  ;;  %v102_v37 = vmul.f32 %v87_v24, %v68_v23  ;;  %326 = vmatprep.mubr.msk.f32.mxu0 %vm403_vm3, %v97_v26  ;;  %334 = vmatprep.mubr.msk.f32.mxu1 %vm410_vm5, %v101_v29 }
   0xb   :  { %v344_v38 = vpack.c.bf16 %v103_v30, %v101_v29  ;;  %v341_v39 = vpack.c.bf16 %v98_v33, %v96_v32  ;;  %vm342_vm8 = vmpackc.low %vm417_vm7, %vm417_vm7  ;;  %vm124_vm9 = vcmp.eq.s32.totalorder %v117_v25, 1 }
   0xc   :  { %340 = vmatprep.subr.msk.bf16.mxu0 %vm339_vm4, %v338_v34  ;;  %v347_v40 = vpack.c.bf16 %v102_v37, %v100_v36  ;;  %vm348_vm10 = vmpackc.low %vm124_vm9, %vm124_vm9  ;;  %v135_v49 = vld [vmem:[#allocation2 + $0x8] sm:$0x3]  ;;  %v137_v50 = vld [vmem:[#allocation2 + $0x18] sm:$0x3] }
   0xd   :  { %346 = vmatprep.subr.msk.bf16.mxu1 %vm345_vm6, %v344_v38  ;;  %343 = vmatpush1.bf16.xpose.msk.msra.mxu0 %vm342_vm8, %v341_v39 }
   0xe   :  { %349 = vmatpush1.bf16.xpose.msk.msra.mxu1 %vm348_vm10, %v347_v40 }
  0x14   :  { %327 = vmatmul.mubr.msk.f32.vlgmr.msra.gmra.mrb[0].mxu0 %vm417_vm7, %v96_v32 }
  0x15   :  { %335 = vmatmul.mubr.msk.f32.vlgmr.msra.gmra.mrb[0].mxu1 %vm124_vm9, %v100_v36  ;;  %328 = vmatprep.mubr.msk.f32.mxu0 %vm403_vm3, %v99_v27 }
  0x16   :  { %336 = vmatprep.mubr.msk.f32.mxu1 %vm410_vm5, %v103_v30 }
  0x18   :  { %329 = vmatmul.mubr.msk.f32.gmra.mrb[2].mxu0 %vm417_vm7, %v98_v33 }
  0x19   :  { %337 = vmatmul.mubr.msk.f32.gmra.mrb[2].mxu1 %vm124_vm9, %v102_v37 }
  0xe7   :  { %v204_v43 = vpop.f32.mrb[0].mxu0 }
  0xe8   :  { %v288_v44 = vadd.f32 %v204_v43, %v134_v41  ;;  %v279_v45 = vpop.f32.mrb[0].mxu1  ;;  %v206_v46 = vpop.f32.mrb[1].mxu0 }
  0xe9   :  { %v290_v47 = vadd.f32 %v279_v45, %v136_v42  ;;  %v281_v48 = vpop.f32.mrb[1].mxu1 }
  0xea   :  { %293 = vst.msk [vmem:[#allocation2] sm:$0xff] %vm56_vm0, %v288_v44 }
  0xeb   :  { %296 = vst.msk [vmem:[#allocation2 + $0x10] sm:$0xff] %vm56_vm0, %v290_v47  ;;  %v209_v51 = vpop.f32.mrb[2].mxu0 }
  0xec   :  { %v289_v52 = vadd.f32 %v209_v51, %v135_v49  ;;  %v284_v53 = vpop.f32.mrb[2].mxu1  ;;  %v211_v54 = vpop.f32.mrb[3].mxu0 }
  0xed   :  { %v291_v55 = vadd.f32 %v284_v53, %v137_v50  ;;  %v286_v56 = vpop.f32.mrb[3].mxu1 }
  0xee   :  { %295 = vst.msk [vmem:[#allocation2 + $0x8] sm:$0x3] %vm58_vm11, %v289_v52 }
  0xef   :  { %297 = vst.msk [vmem:[#allocation2 + $0x18] sm:$0x3] %vm58_vm11, %v291_v55 }
  0xf1   :  { %v301_v57 = vld [vmem:[#allocation2] sm:$0xff] }
  0xf2   :  { %305 = vst.msk [vmem:[%s467_s2] sm:$0xff] %vm56_vm0, %v301_v57  ;;  %v303_v58 = vld [vmem:[#allocation2 + $0x10] sm:$0xff] }
  0xf3   :  { %307 = vst.msk [vmem:[%s467_s2 + $0x10] sm:$0xff] %vm56_vm0, %v303_v58 }
  0xf5   :  { %v302_v59 = vld [vmem:[#allocation2 + $0x8] sm:$0x3] }
  0xf6   :  { %306 = vst.msk [vmem:[%s467_s2 + $0x8] sm:$0x3] %vm58_vm11, %v302_v59  ;;  %v304_v60 = vld [vmem:[#allocation2 + $0x18] sm:$0x3] }
  0xf7   :  { %308 = vst.msk [vmem:[%s467_s2 + $0x18] sm:$0x3] %vm58_vm11, %v304_v60 }

</bundles_post_ra>
